<compile_context>
chip_gen: v7x
topology: tpu7x:2x2x1
jax: 0.10.0
libtpu: 0.0.40
codegen_flags: <defaults>
</compile_context>

<pallas_src>
import functools

import jax
import jax.numpy as jnp
from jax.experimental import pallas as pl
from jax.experimental.pallas import tpu as pltpu


def _round_up(x, m):
    return (x + m - 1) // m * m


TILE_M_MAX = 512          # lane tile for the spatial dim (multiple of 128)


# ---------------------------------------------------------------------------
# Pallas kernel: fused W @ patches^T + bias (+ LeakyReLU), M on the lane axis.
# ---------------------------------------------------------------------------
def conv_mm_kernel(w_ref, p_ref, b_ref, o_ref, *, apply_lrelu, slope):
    # w_ref: (Cp, Kp) bf16   p_ref: (TILE_M, Kp) bf16   b_ref: (Cp, 1) f32
    # o_ref: (Cp, TILE_M) f32  -- lane-dense output tile.
    acc = jax.lax.dot_general(
        w_ref[...], p_ref[...],
        dimension_numbers=(((1,), (1,)), ((), ())),   # contract K with K (NT matmul)
        preferred_element_type=jnp.float32)           # f32 accumulator
    acc = acc + b_ref[...]                            # per-sublane bias, broadcast over lanes
    if apply_lrelu:
        acc = jnp.where(acc >= 0.0, acc, slope * acc)
    o_ref[...] = acc


def conv2d_lrelu_pallas(x_nhwc, w, b, *, stride, padding, apply_lrelu, slope=0.2):
    """x_nhwc: (N,H,W,Cin) f32.  w: (Cout,Cin,kh,kw) (PyTorch layout), b: (Cout,).
    Returns (N,Ho,Wo,Cout) f32."""
    N, H, W, Cin = x_nhwc.shape
    Cout, _, kh, kw = w.shape
    Ho = (H + 2 * padding - kh) // stride + 1
    Wo = (W + 2 * padding - kw) // stride + 1

    # ---- im2col on the NHWC activation (plain-JAX glue) ----
    xp = jnp.pad(x_nhwc, ((0, 0), (padding, padding), (padding, padding), (0, 0)))
    cols = []
    for i in range(kh):
        for j in range(kw):
            cols.append(xp[:, i:i + stride * Ho:stride, j:j + stride * Wo:stride, :])
    patches = jnp.concatenate(cols, axis=-1)           # (N, Ho, Wo, kh*kw*Cin)

    M = N * Ho * Wo
    K = kh * kw * Cin
    patches = patches.reshape(M, K)
    # Weight flattened to match the (kh, kw, Cin) patch-column order.
    w_mat = jnp.transpose(w, (0, 2, 3, 1)).reshape(Cout, K)

    # ---- pad to TPU-friendly tile sizes ----
    Kp = _round_up(K, 128)                 # contraction axis (lane axis of operands)
    Cp = _round_up(Cout, 16)               # sublane axis of the output / weight rows
    tile_m = min(TILE_M_MAX, _round_up(M, 128))
    Mp = _round_up(M, tile_m)

    p_pad = jnp.pad(patches, ((0, Mp - M), (0, Kp - K))).astype(jnp.bfloat16)   # (Mp, Kp)
    w_pad = jnp.pad(w_mat, ((0, Cp - Cout), (0, Kp - K))).astype(jnp.bfloat16)  # (Cp, Kp)
    b_pad = jnp.pad(b, (0, Cp - Cout)).reshape(Cp, 1).astype(jnp.float32)       # (Cp, 1)

    kernel = functools.partial(conv_mm_kernel, apply_lrelu=apply_lrelu, slope=slope)
    out = pl.pallas_call(
        kernel,
        out_shape=jax.ShapeDtypeStruct((Cp, Mp), jnp.float32),
        grid_spec=pltpu.PrefetchScalarGridSpec(
            num_scalar_prefetch=0,
            grid=(Mp // tile_m,),
            in_specs=[
                pl.BlockSpec((Cp, Kp), lambda i: (0, 0)),       # weights resident
                pl.BlockSpec((tile_m, Kp), lambda i: (i, 0)),   # patch tile (pipelined)
                pl.BlockSpec((Cp, 1), lambda i: (0, 0)),        # bias resident
            ],
            out_specs=pl.BlockSpec((Cp, tile_m), lambda i: (0, i)),
        ),
        compiler_params=pltpu.CompilerParams(
            dimension_semantics=("parallel",)),                 # megacore-shardable
    )(w_pad, p_pad, b_pad)

    # (Cp, Mp) -> (M, Cout) -> (N, Ho, Wo, Cout)   (stay in NHWC between layers)
    out = out[:Cout, :M].T.reshape(N, Ho, Wo, Cout)
    return out


# ---------------------------------------------------------------------------
# Discriminator construction (cfg: n_layers=2, norm_type='none',
# num_in_ch=4, num_feat=8) -> layer list matching the PyTorch module.
# norm_type='none'  =>  no norm layers, no spectral norm, use_bias=True.
# ---------------------------------------------------------------------------
def build_layer_defs(num_in_ch=4, num_feat=8, n_layers=2):
    kw, padw = 4, 2  # padw = ceil((4-1)/2) = 2
    defs = [dict(cin=num_in_ch, cout=num_feat, stride=2, pad=padw, lrelu=True)]
    nf_mult = 1
    for n in range(1, n_layers):
        nf_mult_prev, nf_mult = nf_mult, min(2 ** n, 8)
        defs.append(dict(cin=num_feat * nf_mult_prev, cout=num_feat * nf_mult,
                         stride=2, pad=padw, lrelu=True))
    nf_mult_prev, nf_mult = nf_mult, min(2 ** n_layers, 8)
    defs.append(dict(cin=num_feat * nf_mult_prev, cout=num_feat * nf_mult,
                     stride=1, pad=padw, lrelu=True))
    defs.append(dict(cin=num_feat * nf_mult, cout=1, stride=1, pad=padw, lrelu=False))
    return defs


def init_params(layer_defs, key):
    params = []
    for d in layer_defs:
        key, kw_, kb_ = jax.random.split(key, 3)
        fan_in = d["cin"] * 4 * 4
        w = jax.random.normal(kw_, (d["cout"], d["cin"], 4, 4), jnp.float32) / jnp.sqrt(fan_in)
        b = jax.random.normal(kb_, (d["cout"],), jnp.float32) * 0.01
        params.append((w, b))
    return params


def discriminator_forward(params, layer_defs, x_nchw):
    # NCHW only at the module boundary; NHWC between layers (no per-layer
    # transpose round trips through HBM).
    y = jnp.transpose(x_nchw, (0, 2, 3, 1))
    for (w, b), d in zip(params, layer_defs):
        y = conv2d_lrelu_pallas(y, w, b, stride=d["stride"], padding=d["pad"],
                                apply_lrelu=d["lrelu"])
    return jnp.transpose(y, (0, 3, 1, 2))


# Pure-JAX f32 reference (lax conv) for correctness checking.
def discriminator_reference(params, layer_defs, x):
    y = x
    for (w, b), d in zip(params, layer_defs):
        y = jax.lax.conv_general_dilated(
            y, w, window_strides=(d["stride"], d["stride"]),
            padding=((d["pad"], d["pad"]), (d["pad"], d["pad"])),
            dimension_numbers=("NCHW", "OIHW", "NCHW"))
        y = y + b[None, :, None, None]
        if d["lrelu"]:
            y = jnp.where(y >= 0.0, y, 0.2 * y)
    return y


if __name__ == "__main__":
    key = jax.random.PRNGKey(0)
    kx, kp = jax.random.split(key)
    x = jax.random.normal(kx, (2, 4, 16, 16), jnp.float32)   # NCHW input

    layer_defs = build_layer_defs(num_in_ch=4, num_feat=8, n_layers=2)
    params = init_params(layer_defs, kp)

    y = discriminator_forward(params, layer_defs, x)
    y = jax.block_until_ready(y)

    y_ref = discriminator_reference(params, layer_defs, x)
    assert y.shape == y_ref.shape, (y.shape, y_ref.shape)
    # Matmul operands are bf16 (f32 accumulate): ~1e-2 relative error over the
    # 4-layer chain is expected, so use a bf16-appropriate tolerance.
    assert jnp.allclose(y, y_ref, atol=5e-2, rtol=5e-2), (
        "mismatch vs reference, max abs err = %s"
        % float(jnp.max(jnp.abs(y - y_ref))))

    print("KERNEL_OK")
</pallas_src>

<mosaic_0001>
module attributes {stable_mosaic.version = 11 : i64} {
  func.func @conv_mm_kernel(%arg0: i32, %arg1: memref<16x128xbf16, #tpu.memory_space<vmem>>, %arg2: memref<256x128xbf16, #tpu.memory_space<vmem>>, %arg3: memref<16x1xf32, #tpu.memory_space<vmem>>, %arg4: memref<16x256xf32, #tpu.memory_space<vmem>>) attributes {dimension_semantics = [#tpu.dimension_semantics<parallel>], iteration_bounds = array<i64: 1>, scalar_prefetch = 0 : i64, scratch_operands = 0 : i64, tpu.core_type = #tpu.core_type<tc>, window_params = [{pipeline_mode = #tpu.pipeline_mode<synchronous>, transform_indices = @transform_0, window_bounds = array<i64: 16, 128>}, {transform_indices = @transform_1, window_bounds = array<i64: 256, 128>}, {pipeline_mode = #tpu.pipeline_mode<synchronous>, transform_indices = @transform_2, window_bounds = array<i64: 16, 1>}, {transform_indices = @transform_3, window_bounds = array<i64: 16, 256>}]} {
    %c0 = arith.constant 0 : index
    %c0_0 = arith.constant 0 : index
    %0 = vector.load %arg1[%c0, %c0_0] : memref<16x128xbf16, #tpu.memory_space<vmem>>, vector<16x128xbf16>
    %c0_1 = arith.constant 0 : index
    %c0_2 = arith.constant 0 : index
    %1 = vector.load %arg2[%c0_1, %c0_2] : memref<256x128xbf16, #tpu.memory_space<vmem>>, vector<256x128xbf16>
    %cst = arith.constant dense<0.000000e+00> : vector<16x256xf32>
    %2 = tpu.matmul %0, %1, %cst {dimension_numbers = #tpu.dot_dimension_numbers<[1], [1], [0], [0], [0, 0, 1, 0], [], []>} : vector<16x128xbf16>, vector<256x128xbf16>, vector<16x256xf32> -> vector<16x256xf32>
    %c0_3 = arith.constant 0 : index
    %c0_4 = arith.constant 0 : index
    %3 = vector.load %arg3[%c0_3, %c0_4] : memref<16x1xf32, #tpu.memory_space<vmem>>, vector<16x1xf32>
    %4 = vector.broadcast %3 : vector<16x1xf32> to vector<16x256xf32>
    %5 = arith.addf %2, %4 : vector<16x256xf32>
    %cst_5 = arith.constant 0.000000e+00 : f32
    %6 = vector.broadcast %cst_5 : f32 to vector<16x256xf32>
    %7 = arith.cmpf oge, %5, %6 : vector<16x256xf32>
    %cst_6 = arith.constant 2.000000e-01 : f32
    %8 = vector.broadcast %cst_6 : f32 to vector<16x256xf32>
    %9 = arith.mulf %8, %5 : vector<16x256xf32>
    %10 = arith.select %7, %5, %9 : vector<16x256xi1>, vector<16x256xf32>
    %c0_7 = arith.constant 0 : index
    %c0_8 = arith.constant 0 : index
    %11 = vector.load %arg4[%c0_7, %c0_8] : memref<16x256xf32, #tpu.memory_space<vmem>>, vector<16x256xf32>
    tpu.vector_store %arg4[%c0_7, %c0_8], %10 {strides = array<i32>} : memref<16x256xf32, #tpu.memory_space<vmem>>, vector<16x256xf32>,
    return
  }
  func.func @transform_0(%arg0: i32) -> (i32, i32) {
    %c0_i32 = arith.constant 0 : i32
    %c0_i32_0 = arith.constant 0 : i32
    %c0_i32_1 = arith.constant 0 : i32
    return %c0_i32, %c0_i32_0 : i32, i32
  }
  func.func @transform_1(%arg0: i32) -> (i32, i32) {
    %c0_i32 = arith.constant 0 : i32
    %c0_i32_0 = arith.constant 0 : i32
    return %arg0, %c0_i32 : i32, i32
  }
  func.func @transform_2(%arg0: i32) -> (i32, i32) {
    %c0_i32 = arith.constant 0 : i32
    %c0_i32_0 = arith.constant 0 : i32
    %c0_i32_1 = arith.constant 0 : i32
    return %c0_i32, %c0_i32_0 : i32, i32
  }
  func.func @transform_3(%arg0: i32) -> (i32, i32) {
    %c0_i32 = arith.constant 0 : i32
    %c0_i32_0 = arith.constant 0 : i32
    return %c0_i32, %arg0 : i32, i32
  }
}

</mosaic_0001>

<bundles_post_ra>
// kernel: tpu_custom_call.1
= control target key start
LH: loop header
LB: loop body
LE: loop exit
PB: predicated region body
PF: predicated region fallthrough
CT: control target
= control target key end

     0   :  { %8 = vsyncpa [#allocation3], 0  ;;  %s422_s0 = inlined_call_operand.vmem [shape: bf16[16,128], index: 0, kind: input, shape index: {}]   ;;  %s423_s1 = inlined_call_operand.hbm [shape: bf16[256,128], index: 1, kind: input, shape index: {}]   ;;  %s424_s2 = inlined_call_operand.vmem [shape: f32[16,1], index: 2, kind: input, shape index: {}]   ;;  %s425_s3 = inlined_call_operand.hbm [shape: f32[16,256], index: 3, kind: output, shape index: {}]  }
   0x1   :  { %9 = vsyncpa [#allocation4], 0  ;;  %s362_s12 = smov [#allocation2]   ;;  %s314_s16 = scalar_lea.hbm %s423_s1, 2048 }
   0x2   :  { %s17_s13 = sshll.u32 %s362_s12, 4  ;;  %p315_p0 = scmp.ne.s32.totalorder %s423_s1, %s314_s16  ;;  %s18_s13 = int_to_ptr.vmem [resolvable:$true] %s17_s13 }
   0x3   :  { %p318_p1 = scmp.lt.u32.totalorder %s314_s16, %s423_s1 }
   0x5   :  { %p320_p2 = pnand %p318_p1, %p315_p0 }
   0x7   :  { %323 = shalt.err (!%p320_p2)
}
   0x8   :  { %s324_s21 = scalar_lea.vmem %s18_s13, 2048  ;;  %p329_p4 = scmp.lt.s32.totalorder %s18_s13, %s18_s13 }
   0x9   :  { %p325_p3 = scmp.ne.s32.totalorder %s18_s13, %s324_s21  ;;  %p330_p5 = scmp.lt.s32.totalorder %s324_s21, %s324_s21 }
   0xb   :  { %p331_p6 = por %p330_p5, %p329_p4 }
   0xd   :  { %p332_p7 = pnand %p331_p6, %p325_p3 }
   0xf   :  { %335 = shalt.err (!%p332_p7)
}
  0x10   :  { %s363_s22 = smov 64   ;;  %s364_s23 = smov 4  }
  0x11   :  { %23 = dma.hbm_to_vmem [thread:$0]  %s423_s1, 2048, %s18_s13, [#allocation3], %s363_s22, %s363_s22, %s364_s23  }
  0x12   :  { %358 = dma.done.wait [#allocation3], 2048  }
  0x13   :  { %359 = vsyncadd [#allocation3], 4294965248  ;;  %v365_v0 = vmov 0   ;;  %v297_v1 = vld [vmem:[#allocation2 + $0x40] sm:$0xff]   ;;  %v299_v3 = vld [vmem:[#allocation2 + $0x48] sm:$0xff]  }
  0x14   :  { %296 = vset.pattern.permute.xlu0 %v365_v0  ;;  %v298_v2 = vld [vmem:[#allocation2] sm:$0xff]   ;;  %271 = vmatprep.subr.bf16.mxu0 %v297_v1  ;;  %v300_v4 = vld [vmem:[#allocation2 + $0x8] sm:$0xff]   ;;  %v301_v5 = vld [vmem:[#allocation2 + $0x50] sm:$0xff]  }
  0x15   :  { %272 = vmatpush3.bf16.xpose.msra.mxu0 %v298_v2  ;;  %v302_v6 = vld [vmem:[#allocation2 + $0x10] sm:$0xff]   ;;  %v303_v7 = vld [vmem:[#allocation2 + $0x58] sm:$0xff]   ;;  %v313_v8 = vld [vmem:[%s422_s0] sm:$0xff]   ;;  %s366_s0 = smov [#allocation5]  }
  0x16   :  { %273 = vmatprep.subr.bf16.mxu0 %v299_v3  ;;  %v64_v9 = vld [vmem:[%s424_s2] sm:$0xff]  ;;  %287 = vmatprep.mubr.bf16.mxu0 %v313_v8  ;;  %v65_v10 = vld [vmem:[%s424_s2 + $0x8] sm:$0xff]  ;;  %v304_v11 = vld [vmem:[#allocation2 + $0x18] sm:$0xff]   ;;  %s242_s2 = sshll.u32 %s366_s0, 4  ;;  %s243_s2 = int_to_ptr.vmem [resolvable:$true] %s242_s2 }
  0x17   :  { %68 = vperm.xlu0 %296, %v64_v9   ;;  %v305_v12 = vld [vmem:[#allocation2 + $0x60] sm:$0xff]   ;;  %v307_v14 = vld [vmem:[#allocation2 + $0x68] sm:$0xff]   ;;  %v309_v16 = vld [vmem:[#allocation2 + $0x70] sm:$0xff]   ;;  %s336_s4 = scalar_lea.vmem %s243_s2, 512  ;;  %p341_p9 = scmp.lt.s32.totalorder %s243_s2, %s243_s2 }
  0x18   :  { %v306_v13 = vld [vmem:[#allocation2 + $0x20] sm:$0xff]   ;;  %v308_v15 = vld [vmem:[#allocation2 + $0x28] sm:$0xff]   ;;  %v310_v17 = vld [vmem:[#allocation2 + $0x30] sm:$0xff]   ;;  %p337_p8 = scmp.ne.s32.totalorder %s243_s2, %s336_s4  ;;  %p342_p10 = scmp.lt.s32.totalorder %s336_s4, %s336_s4 }
  0x19   :  { %v311_v18 = vld [vmem:[#allocation2 + $0x78] sm:$0xff]  }
  0x1a   :  { %v312_v19 = vld [vmem:[#allocation2 + $0x38] sm:$0xff]   ;;  %p343_p11 = por %p342_p10, %p341_p9 }
  0x1b   :  { %73 = vperm.xlu0 %296, %v65_v10  }
  0x1c   :  { %p344_p12 = pnand %p343_p11, %p337_p8 }
  0x1d   :  { %274 = vmatpush3.bf16.xpose.msra.mxu0 %v300_v4 }
  0x1e   :  { %275 = vmatprep.subr.bf16.mxu0 %v301_v5 }
  0x25   :  { %276 = vmatpush3.bf16.xpose.msra.mxu0 %v302_v6 }
  0x26   :  { %277 = vmatprep.subr.bf16.mxu0 %v303_v7 }
  0x2d   :  { %278 = vmatpush3.bf16.xpose.msra.mxu0 %v304_v11 }
  0x2e   :  { %279 = vmatprep.subr.bf16.mxu0 %v305_v12 }
  0x35   :  { %280 = vmatpush3.bf16.xpose.msra.mxu0 %v306_v13 }
  0x36   :  { %281 = vmatprep.subr.bf16.mxu0 %v307_v14 }
  0x3d   :  { %282 = vmatpush3.bf16.xpose.msra.mxu0 %v308_v15 }
  0x3e   :  { %283 = vmatprep.subr.bf16.mxu0 %v309_v16 }
  0x45   :  { %284 = vmatpush3.bf16.xpose.msra.mxu0 %v310_v17 }
  0x46   :  { %285 = vmatprep.subr.bf16.mxu0 %v311_v18 }
  0x4d   :  { %286 = vmatpush3.bf16.xpose.msra.mxu0 %v312_v19 }
  0x54   :  { %288 = vmatmul.mubr.bf16.vlgmr.msra.gmra.mrb[0].mxu0 %v313_v8 }
  0x96   :  { %v69_v20 = vpop.permute.xlu0 %68 }
  0x9a   :  { %v74_v24 = vpop.permute.xlu0 %73 }
 0x127   :  { %v212_v21 = vpop.f32.mrb[0].mxu0 }
 0x128   :  { %v213_v22 = vadd.f32 %v212_v21, %v69_v20  ;;  %v214_v23 = vpop.f32.mrb[1].mxu0 }
 0x129   :  { %v215_v25 = vadd.f32 %v214_v23, %v69_v20  ;;  %v216_v26 = vpop.f32.mrb[2].mxu0 }
 0x12a   :  { %vm221_vm0 = vcmp.ge.f32.partialorder %v213_v22, 0.0  ;;  %v225_v27 = vmul.f32 0.2, %v213_v22  ;;  %v217_v28 = vadd.f32 %v216_v26, %v74_v24  ;;  %v218_v29 = vpop.f32.mrb[3].mxu0 }
 0x12b   :  { %vm222_vm1 = vcmp.ge.f32.partialorder %v215_v25, 0.0  ;;  %v226_v30 = vmul.f32 0.2, %v215_v25  ;;  %v219_v31 = vadd.f32 %v218_v29, %v74_v24 }
 0x12c   :  { %v229_v32 = vsel %vm221_vm0, %v213_v22, %v225_v27  ;;  %vm223_vm2 = vcmp.ge.f32.partialorder %v217_v28, 0.0  ;;  %v227_v33 = vmul.f32 0.2, %v217_v28 }
 0x12d   :  { %233 = vst [vmem:[#allocation5] sm:$0xff] %v229_v32  ;;  %v230_v34 = vsel %vm222_vm1, %v215_v25, %v226_v30  ;;  %vm224_vm3 = vcmp.ge.f32.partialorder %v219_v31, 0.0  ;;  %v228_v35 = vmul.f32 0.2, %v219_v31 }
 0x12e   :  { %234 = vst [vmem:[#allocation5 + $0x8] sm:$0xff] %v230_v34  ;;  %v231_v36 = vsel %vm223_vm2, %v217_v28, %v227_v33 }
 0x12f   :  { %235 = vst [vmem:[#allocation5 + $0x10] sm:$0xff] %v231_v36  ;;  %v232_v37 = vsel %vm224_vm3, %v219_v31, %v228_v35 }
 0x130   :  { %236 = vst [vmem:[#allocation5 + $0x18] sm:$0xff] %v232_v37 }
 0x131   :  { %347 = shalt.err (!%p344_p12)
}
 0x132   :  { %s348_s7 = scalar_lea.hbm %s425_s3, 512 }
 0x133   :  { %p349_p13 = scmp.ne.s32.totalorder %s425_s3, %s348_s7  ;;  %p352_p0 = scmp.lt.u32.totalorder %s348_s7, %s425_s3 }
 0x135   :  { %p354_p1 = pnand %p352_p0, %p349_p13 }
 0x137   :  { %357 = shalt.err (!%p354_p1)
}
 0x138   :  { %s367_s12 = smov 256   ;;  %s368_s13 = smov 16  }
 0x139   :  { %248 = dma.vmem_to_hbm [thread:$0]  %s243_s2, 512, %s425_s3, [#allocation4], %s367_s12, %s367_s12, %s368_s13  }
 0x13a   :  { %360 = dma.done.wait [#allocation4], 512  }
 0x13b   :  { %361 = vsyncadd [#allocation4], 4294966784 }
 0x13c   :  { %252 = vsyncpa [#allocation3], 1 }
 0x13d   :  { %253 = vsyncpa [#allocation4], 1 }

</bundles_post_ra>
